<compile_context>
chip_gen: v6e
topology: v6e:2x2x1
jax: 0.10.0
libtpu: 0.0.40
codegen_flags: <defaults>
</compile_context>

<pallas_src>
import functools

import jax
import jax.numpy as jnp
from jax.experimental import pallas as pl
from jax.experimental.pallas import tpu as pltpu


def _device_tuning():
    """Per-generation (tile byte budget, use CORE_PARALLEL on grid axis 0)."""
    try:
        kind = jax.devices()[0].device_kind.lower()
    except Exception:
        kind = ""
    if "v5 lite" in kind or "v5lite" in kind or "v5e" in kind:
        # v5e: 16 MiB scoped-VMEM default -> keep the double-buffered set small.
        return int(1.5 * (1 << 20)), False
    if "v6" in kind:
        # v6e: 32 MiB scoped default; larger tiles push the copy toward roofline.
        return 4 * (1 << 20), False
    if "v7" in kind:
        # v7x: 64 MiB physical VMEM, 3.2 TB/s HBM, 2 TCs -> few large tiles
        # plus CORE_PARALLEL across both TensorCores.
        return 4 * (1 << 20), True
    return 2 * (1 << 20), False


def _choose_row_tile(H, B, row_bytes, row_align, budget, prefer_whole_h):
    """Pick TH: a divisor of H that is a multiple of the packed-sublane tile
    (32/itemsize rows), or H itself (full-dim blocks are always legal)."""
    if prefer_whole_h and H * row_bytes <= budget:
        # Whole-H tile: the H roll becomes one in-kernel sublane roll (single
        # read + single write), avoiding the 1.5-2x traffic of the split path.
        return H
    cands = sorted({t for t in range(row_align, H, row_align) if H % t == 0} | {H})
    # Pipeline overlap comes from the *whole* flattened grid (B * nH steps).
    pipelined = [t for t in cands if t * row_bytes <= budget and B * (H // t) >= 2]
    if pipelined:
        return max(pipelined)
    fitting = [t for t in cands if t * row_bytes <= budget]
    if fitting:
        return max(fitting)
    return min(cands)


def _roll_whole_kernel(x_ref, o_ref, *, sub_shift, lane_shift):
    """Single-input whole-H tile: H roll = sublane roll, W roll = lane roll."""
    x = x_ref[...]                                     # (H, W*C)
    if sub_shift:
        x = pltpu.roll(x, shift=sub_shift, axis=0)     # H roll (XLU, sublane)
    if lane_shift:
        x = pltpu.roll(x, shift=lane_shift, axis=1)    # W roll (XLU, lane)
    o_ref[...] = x


def _roll_aligned_kernel(x_ref, o_ref, *, lane_shift):
    """H roll is tile-aligned (folded into the index_map): copy + lane roll."""
    x = x_ref[...]                                     # (TH, W*C)
    if lane_shift:
        x = pltpu.roll(x, shift=lane_shift, axis=1)
    o_ref[...] = x


def _roll_split_kernel(a_ref, b_ref, o_ref, *, th, r, lane_shift):
    """Unaligned multi-tile fallback: output tile = last r rows of the previous
    (rolled-order) tile + first (th - r) rows of the current one.  Lane-roll
    the FULL aligned tiles first; slice/store afterwards (no relayout on
    sublane-unaligned sub-views, no concatenate temporaries)."""
    a = a_ref[...]
    b = b_ref[...]
    if lane_shift:
        a = pltpu.roll(a, shift=lane_shift, axis=1)
        b = pltpu.roll(b, shift=lane_shift, axis=1)
    o_ref[:r, :] = a[th - r:, :]
    o_ref[r:, :] = b[:th - r, :]


def cyclic_shift(x, displacement, *, max_tile_bytes=None):
    """Pallas TPU implementation of CyclicShift.forward.

    Args:
      x: (B, H, W, C) array.
      displacement: int or 2-tuple; as in the reference module, only
        displacement[0] is used (for BOTH spatial dims).
      max_tile_bytes: optional override of the per-generation tile budget
        (mainly to exercise the tiled code paths at small test shapes).
    """
    if isinstance(displacement, (tuple, list)):
        d = int(displacement[0])      # reference-module quirk: [0] for both dims
    else:
        d = int(displacement)

    B, H, W, C = x.shape
    WC = W * C
    itemsize = jnp.dtype(x.dtype).itemsize

    sh = d % H                        # H roll (non-negative; handles negative d)
    sw = d % W                        # W roll
    lane_shift = sw * C               # W roll by sw == flat (W*C) roll by sw*C

    if sh == 0 and lane_shift == 0:   # identity: skip the HBM round-trip
        return x

    budget, core_parallel0 = _device_tuning()
    if max_tile_bytes is not None:
        budget = int(max_tile_bytes)
    row_bytes = WC * itemsize
    # Packed-sublane alignment: 8 rows for f32, 16 for bf16, 32 for int8/fp8.
    row_align = max(8, 32 // itemsize)

    TH = _choose_row_tile(H, B, row_bytes, row_align, budget,
                          prefer_whole_h=(sh != 0))
    nH = H // TH

    # Lane-dense view: merge trailing dims (free, contiguous-dim merge).
    x2 = x.reshape(B, H, WC)
    out_shape = jax.ShapeDtypeStruct((B, H, WC), x.dtype)

    first_sem = pltpu.CORE_PARALLEL if core_parallel0 else pltpu.PARALLEL

    if nH == 1:
        # Single-input, single-tile-per-batch path (all standard Swin stages).
        kernel = functools.partial(_roll_whole_kernel,
                                   sub_shift=sh, lane_shift=lane_shift)
        out2 = pl.pallas_call(
            kernel,
            out_shape=out_shape,
            grid_spec=pltpu.PrefetchScalarGridSpec(
                num_scalar_prefetch=0,
                grid=(B,),
                in_specs=[pl.BlockSpec((None, H, WC), lambda b: (b, 0, 0))],
                out_specs=pl.BlockSpec((None, H, WC), lambda b: (b, 0, 0)),
            ),
            compiler_params=pltpu.CompilerParams(
                dimension_semantics=(first_sem,)),
        )(x2)
        return out2.reshape(B, H, W, C)

    q, r = divmod(sh, TH)             # tile-aligned part + remainder
    params = pltpu.CompilerParams(
        dimension_semantics=(first_sem, pltpu.PARALLEL))

    out_spec = pl.BlockSpec((None, TH, WC), lambda b, h: (b, h, 0))
    # "current" source tile: block-level part of the H roll folded into the
    # index_map (pure permuted DMA, zero in-kernel work).
    b_spec = pl.BlockSpec((None, TH, WC),
                          lambda b, h: (b, (h - q + nH) % nH, 0))

    if r == 0:
        kernel = functools.partial(_roll_aligned_kernel, lane_shift=lane_shift)
        out2 = pl.pallas_call(
            kernel,
            out_shape=out_shape,
            grid_spec=pltpu.PrefetchScalarGridSpec(
                num_scalar_prefetch=0,
                grid=(B, nH),
                in_specs=[b_spec],
                out_specs=out_spec,
            ),
            compiler_params=params,
        )(x2)
    else:
        # "previous" source tile in rolled order (supplies the top r rows).
        a_spec = pl.BlockSpec((None, TH, WC),
                              lambda b, h: (b, (h - q - 1 + nH) % nH, 0))
        kernel = functools.partial(_roll_split_kernel,
                                   th=TH, r=r, lane_shift=lane_shift)
        out2 = pl.pallas_call(
            kernel,
            out_shape=out_shape,
            grid_spec=pltpu.PrefetchScalarGridSpec(
                num_scalar_prefetch=0,
                grid=(B, nH),
                in_specs=[a_spec, b_spec],
                out_specs=out_spec,
            ),
            compiler_params=params,
        )(x2, x2)

    return out2.reshape(B, H, W, C)


if __name__ == "__main__":
    key = jax.random.PRNGKey(0)
    B, H, W, C = 2, 16, 16, 32
    x = jax.random.normal(key, (B, H, W, C), dtype=jnp.float32)

    def ref(x, d):
        d0 = d[0] if isinstance(d, (tuple, list)) else d
        return jnp.roll(x, shift=(d0, d0), axis=(1, 2))

    # 1) Default path: whole-H single-input tile + in-kernel sublane/lane rolls.
    displacement = 3
    out = jax.block_until_ready(cyclic_shift(x, displacement))
    assert out.shape == x.shape and out.dtype == x.dtype
    assert jnp.array_equal(out, ref(x, displacement)), "whole-tile path mismatch"

    # 2) Tiled aligned path (shift multiple of TH -> pure permuted DMA + lane roll).
    small_budget = 8 * W * C * x.dtype.itemsize
    out = jax.block_until_ready(cyclic_shift(x, 8, max_tile_bytes=small_budget))
    assert jnp.array_equal(out, ref(x, 8)), "aligned tiled path mismatch"

    # 3) Tiled split path (remainder r != 0), with a negative tuple displacement
    #    to also cover the displacement[0]-for-both-dims quirk and wraparound.
    disp = (-3, 5)
    out = jax.block_until_ready(cyclic_shift(x, disp, max_tile_bytes=small_budget))
    assert jnp.array_equal(out, ref(x, disp)), "split tiled path mismatch"

    print("KERNEL_OK")
</pallas_src>

<mosaic_0001>
module attributes {stable_mosaic.version = 11 : i64} {
  func.func @_roll_whole_kernel(%arg0: i32, %arg1: memref<1x16x512xf32, #tpu.memory_space<vmem>>, %arg2: memref<1x16x512xf32, #tpu.memory_space<vmem>>) attributes {dimension_semantics = [#tpu.dimension_semantics<parallel>], iteration_bounds = array<i64: 2>, scalar_prefetch = 0 : i64, scratch_operands = 0 : i64, tpu.core_type = #tpu.core_type<tc>, window_params = [{transform_indices = @transform_0, window_bounds = array<i64: 1, 16, 512>}, {transform_indices = @transform_1, window_bounds = array<i64: 1, 16, 512>}]} {
    %c0 = arith.constant 0 : index
    %c0_0 = arith.constant 0 : index
    %c0_1 = arith.constant 0 : index
    %0 = vector.load %arg1[%c0, %c0_0, %c0_1] : memref<1x16x512xf32, #tpu.memory_space<vmem>>, vector<1x16x512xf32>
    %1 = vector.shape_cast %0 : vector<1x16x512xf32> to vector<16x512xf32>
    %c3_i32 = arith.constant 3 : i32
    %2 = tpu.dynamic_rotate %1 by %c3_i32 dim 0 : vector<16x512xf32>, i32 -> vector<16x512xf32>
    %c96_i32 = arith.constant 96 : i32
    %3 = tpu.dynamic_rotate %2 by %c96_i32 dim 1 : vector<16x512xf32>, i32 -> vector<16x512xf32>
    %c0_2 = arith.constant 0 : index
    %c0_3 = arith.constant 0 : index
    %c0_4 = arith.constant 0 : index
    %4 = vector.load %arg2[%c0_2, %c0_3, %c0_4] : memref<1x16x512xf32, #tpu.memory_space<vmem>>, vector<1x16x512xf32>
    %5 = vector.shape_cast %4 : vector<1x16x512xf32> to vector<16x512xf32>
    %6 = vector.shape_cast %3 : vector<16x512xf32> to vector<1x16x512xf32>
    tpu.vector_store %arg2[%c0_2, %c0_3, %c0_4], %6 {strides = array<i32>} : memref<1x16x512xf32, #tpu.memory_space<vmem>>, vector<1x16x512xf32>,
    return
  }
  func.func @transform_0(%arg0: i32) -> (i32, i32, i32) {
    %c0_i32 = arith.constant 0 : i32
    %c0_i32_0 = arith.constant 0 : i32
    %c0_i32_1 = arith.constant 0 : i32
    return %arg0, %c0_i32, %c0_i32_0 : i32, i32, i32
  }
  func.func @transform_1(%arg0: i32) -> (i32, i32, i32) {
    %c0_i32 = arith.constant 0 : i32
    %c0_i32_0 = arith.constant 0 : i32
    %c0_i32_1 = arith.constant 0 : i32
    return %arg0, %c0_i32, %c0_i32_0 : i32, i32, i32
  }
}

</mosaic_0001>

<bundles_post_ra>
// kernel: tpu_custom_call.1
= control target key start
LH: loop header
LB: loop body
LE: loop exit
PB: predicated region body
PF: predicated region fallthrough
CT: control target
= control target key end

     0   :  { %6 = vsyncpa [#allocation3], 0  ;;  %s636_s0 = inlined_call_operand.hbm [shape: f32[2,16,512], index: 0, kind: input, shape index: {}]   ;;  %s637_s1 = inlined_call_operand.hbm [shape: f32[2,16,512], index: 1, kind: output, shape index: {}]  }
   0x1   :  { %8 = vsyncpa [#allocation3 + $0x1], 0 }
   0x2   :  { %9 = vsyncpa [#allocation4], 0 }
   0x3   :  { %11 = vsyncpa [#allocation4 + $0x1], 0  ;;  %s462_s6 = smov 0   ;;  %s464_s7 = smov 0  }
   0x4   :  { %s466_s8 = smov 0   ;;  %s468_s9 = smov 0  }
   0x5 LB: > { %s483_s10 = sadd.s32 4294967295, %s443_s9   ;;  %s284_s11 = sadd.s32 4294967294, %s443_s9   ;;  %s443_s9 = sphi %s468_s9, %s652_s9   ;;  %s439_s8 = sphi %s466_s8, %s651_s8   ;;  %s435_s7 = sphi %s464_s7, %s650_s7   ;;  %s431_s6 = sphi %s462_s6, %s649_s6  }
   0x6   : > { %s487_s12 = sadd.s32 1, %s443_s9   ;;  %s24_s13 = sadd.s32 1, %s439_s8 }
   0x7   : > { %s21_s14 = ssub.s32 %s443_s9, %s487_s12  ;;  %p31_p0 = scmp.ne.s32.totalorder %s439_s8, %s435_s7 }
   0x8   : > { %p22_p1 = scmp.eq.s32.totalorder %s21_s14, 0  ;;  %p32_p2 = scmp.eq.s32.totalorder %s443_s9, 0 }
   0x9   : > { %p37_p3 = scmp.ne.s32.totalorder %s435_s7, %s431_s6  ;;  %p38_p4 = scmp.eq.s32.totalorder %s483_s10, 0 }
   0xa   : > { %s499_s15 = scalar_select %p22_p1, %s439_s8, %s24_s13  }
   0xb   : > { %p501_p5 = por %p32_p2, %p31_p0  ;;  %p505_p6 = por %p38_p4, %p37_p3 }
   0xc   : > { %p61_p7 = scmp.eq.s32.totalorder %s483_s10, 1  ;;  %p67_p8 = scmp.eq.s32.totalorder %s284_s11, 1 }
   0xd   : > { %s641_s17 = scalar_select %p505_p6, 1, 0 }
   0xe   : > { %p312_p10 = scmp.lt.s32.totalorder %s443_s9, 2  ;;  %p512_p11 = por %p61_p7, %p31_p0 }
   0xf   : > { %p516_p12 = por %p67_p8, %p37_p3  ;;  %s87_s20 = sand.u32 1, %s439_s8  }
  0x10   : > { %s642_s18 = scalar_select %p512_p11, 1, 0 }
  0x11   : > { %s643_s19 = scalar_select %p516_p12, 1, 0 }
  0x12   : > { %s298_s21 = sshll.u32 %s443_s9, 10  ;;  %s287_s22 = sshll.u32 %s87_s20, 6 }
  0x13   : > { %s525_s25 = scalar_lea.hbm %s636_s0, %s298_s21  ;;  %s91_s26 = scalar_lea.vmem [#allocation2], %s287_s22 }
  0x14   : > { %s98_s27 = sshll.u32 %s91_s26, 4  ;;  %p529_p13 = pnand %p312_p10, %p501_p5  ;;  %s533_s27 = int_to_ptr.vmem [resolvable:$true] %s98_s27 }
  0x15   : > { %s535_s29 = scalar_lea.sflag [#allocation3], %s87_s20  ;;  %s351_s30 = scalar_lea.hbm %s525_s25, 1024 }
  0x16   : > { %p352_p0 = scmp.ne.s32.totalorder %s525_s25, %s351_s30  ;;  %p353_p1 = pneg %p529_p13 }
  0x17   : > { %s356_s4 = scalar_lea.hbm %s636_s0, 2048  ;;  %p357_p4 = scmp.lt.s32.totalorder %s525_s25, %s636_s0 }
  0x18   : > { %p354_p2 = pnand %p353_p1, %p352_p0  ;;  %p358_p5 = scmp.lt.s32.totalorder %s356_s4, %s351_s30 }
  0x1a   : > { %p355_p3 = pneg %p354_p2  ;;  %p359_p7 = por %p358_p5, %p357_p4 }
  0x1c   : > { %p360_p8 = pnand %p359_p7, %p355_p3 }
  0x1e   : > { %363 = shalt.err (!%p360_p8)
}
  0x1f   : > { %s364_s13 = scalar_lea.vmem %s533_s27, 1024  ;;  %s445_s14 = smov [#allocation2]  }
  0x20   : > { %p365_p10 = scmp.ne.s32.totalorder %s533_s27, %s364_s13  ;;  %s369_s16 = sshll.u32 %s445_s14, 4  ;;  %s370_s16 = int_to_ptr.vmem [resolvable:$false] %s369_s16 }
  0x21   : > { %s371_s20 = scalar_lea.vmem %s370_s16, 2048  ;;  %p372_p2 = scmp.lt.s32.totalorder %s533_s27, %s370_s16 }
  0x22   : > { %p367_p9 = pnand %p365_p10, %p353_p1  ;;  %p373_p12 = scmp.lt.s32.totalorder %s371_s20, %s364_s13 }
  0x24   : > { %p368_p0 = pneg %p367_p9  ;;  %p374_p11 = por %p373_p12, %p372_p2 }
  0x26   : > { %p375_p6 = pnand %p374_p11, %p368_p0 }
  0x28   : > { %378 = shalt.err (!%p375_p6)
}
  0x29   : > { %s446_s21 = smov 512   ;;  %s447_s22 = smov 32  }
  0x2a   : > { %307 = dma.hbm_to_vmem [thread:$0]  (!%p529_p13), %s525_s25, 1024, %s533_s27, %s535_s29, %s446_s21, %s446_s21, %s447_s22  }
  0x2b   : > { %p290_p9 = scmp.ge.s32.totalorder %s443_s9, 1  ;;  %p106_p1 = scmp.lt.s32.totalorder %s443_s9, 3 }
  0x2d   : > { %p107_p3 = pnand %p290_p9, %p106_p1 }
  0x2e   : > { %s559_s23 = sand.u32 (!%p107_p3), 1, %s435_s7   ;;  %p645_p6 = scmp.ne.s32.totalorder (!%p107_p3), %s641_s17, 0 }
  0x2f   : > { %110 = sbr.rel (%p107_p3) target bundleno = 202 (0xca), region = 24  ;;  %s291_s24 = sshll.u32 (!%p107_p3), %s559_s23, 6 }
  0x30   : > { %s113_s26 = scalar_lea.sflag (!%p107_p3), [#allocation3], %s559_s23  ;;  %s116_s30 = scalar_lea.vmem (!%p107_p3), [#allocation2], %s291_s24 }
  0x34   : > { %422 = dma.done.wait (%p645_p6), %s113_s26, 1024  }
  0x35   : > { %424 = vsyncadd (%p645_p6), %s113_s26, 4294966272  ;;  %v151_v0 = vlaneseq  ;;  %v136_v2 = vld [vmem:[%s116_s30 + $0x8] sm:$0xff]  ;;  %v135_v4 = vld [vmem:[%s116_s30] sm:$0xff]  ;;  %s448_s25 = smov 96   ;;  %s134_s17 = scalar_lea.vmem [#allocation5], %s291_s24 }
  0x36   : > { %v140_v3 = vld [vmem:[%s116_s30 + $0x28] sm:$0xff]  ;;  %v144_v5 = vrot.slane %v136_v2, 5  ;;  %v139_v7 = vld [vmem:[%s116_s30 + $0x20] sm:$0xff]  ;;  %v143_v8 = vrot.slane %v135_v4, 5  ;;  %v137_v10 = vld [vmem:[%s116_s30 + $0x10] sm:$0xff]  ;;  %s211_s27 = sshll.u32 %s134_s17, 4  ;;  %s584_s27 = int_to_ptr.vmem [resolvable:$true] %s211_s27 }
  0x37   : > { %v152_v1 = vshrl.u32 %v151_v0, 7  ;;  %v148_v6 = vrot.slane %v140_v3, 5  ;;  %v147_v9 = vrot.slane %v139_v7, 5  ;;  %v141_v11 = vld [vmem:[%s116_s30 + $0x30] sm:$0xff]  ;;  %v145_v15 = vrot.slane %v137_v10, 5  ;;  %v138_v18 = vld [vmem:[%s116_s30 + $0x18] sm:$0xff] }
  0x38   : > { %v149_v16 = vrot.slane %v141_v11, 5  ;;  %v142_v19 = vld [vmem:[%s116_s30 + $0x38] sm:$0xff]  ;;  %v146_v21 = vrot.slane %v138_v18, 5  ;;  %v179_v26 = vand.u32 127, %v151_v0  ;;  %s299_s28 = sshll.u32 %s483_s10, 10  ;;  %s198_s10 = scalar_lea.sflag [#allocation4], %s559_s23 }
  0x39   : > { %vm153_vm0 = vcmp.lt.s32.totalorder %v152_v1, 3  ;;  %v150_v22 = vrot.slane %v142_v19, 5  ;;  %s589_s3 = scalar_lea.hbm %s637_s1, %s299_s28  ;;  %s379_s4 = scalar_lea.vmem %s584_s27, 1024 }
  0x3a   : > { %v159_v12 = vsel %vm153_vm0, %v148_v6, %v144_v5  ;;  %v158_v13 = vsel %vm153_vm0, %v147_v9, %v143_v8  ;;  %v155_v14 = vsel %vm153_vm0, %v144_v5, %v148_v6  ;;  %v154_v17 = vsel %vm153_vm0, %v143_v8, %v147_v9  ;;  %p380_p11 = scmp.ne.s32.totalorder %s584_s27, %s379_s4  ;;  %p646_p12 = scmp.ne.s32.totalorder %s642_s18, 0 }
  0x3b   : > { %166 = vrot.lane.b32.xlu1 %v159_v12, %s448_s25  ;;  %162 = vrot.lane.b32.xlu0 %v158_v13, %s448_s25  ;;  %v156_v20 = vsel %vm153_vm0, %v145_v15, %v149_v16  ;;  %v160_v23 = vsel %vm153_vm0, %v149_v16, %v145_v15  ;;  %v157_v24 = vsel %vm153_vm0, %v146_v21, %v150_v22  ;;  %vm180_vm1 = vcmp.lt.s32.totalorder %v179_v26, 96  ;;  %s449_s5 = smov [#allocation5]  }
  0x3c   : > { %v161_v25 = vsel %vm153_vm0, %v150_v22, %v146_v21  ;;  %p381_p13 = pnand %p380_p11, %p646_p12  ;;  %s383_s11 = sshll.u32 %s449_s5, 4  ;;  %s384_s11 = int_to_ptr.vmem [resolvable:$false] %s383_s11 }
  0x3d   : > { %s385_s13 = scalar_lea.vmem %s384_s11, 2048  ;;  %p386_p5 = scmp.lt.s32.totalorder %s584_s27, %s384_s11 }
  0x3e   : > { %p382_p4 = pneg %p381_p13  ;;  %p387_p7 = scmp.lt.s32.totalorder %s385_s13, %s379_s4 }
  0x3f   : > { %168 = vrot.lane.b32.xlu1 %v155_v14, %s448_s25  ;;  %164 = vrot.lane.b32.xlu0 %v154_v17, %s448_s25 }
  0x40   : > { %p388_p8 = por %p387_p7, %p386_p5 }
  0x42   : > { %p389_p10 = pnand %p388_p8, %p382_p4 }
  0x43   : > { %172 = vrot.lane.b32.xlu1 %v156_v20, %s448_s25  ;;  %170 = vrot.lane.b32.xlu0 %v160_v23, %s448_s25 }
  0x47   : > { %176 = vrot.lane.b32.xlu1 %v157_v24, %s448_s25  ;;  %174 = vrot.lane.b32.xlu0 %v161_v25, %s448_s25 }
  0xad   : > { %v167_v27 = vpop.permute.xlu1 %166  ;;  %v163_v28 = vpop.permute.xlu0 %162 }
  0xae   : > { %v185_v29 = vsel %vm180_vm1, %v163_v28, %v167_v27 }
  0xaf   : > { %190 = vst [vmem:[%s134_s17 + $0x8] sm:$0xff] %v185_v29 }
  0xb1   : > { %v169_v30 = vpop.permute.xlu1 %168  ;;  %v165_v31 = vpop.permute.xlu0 %164 }
  0xb2   : > { %v186_v32 = vsel %vm180_vm1, %v165_v31, %v169_v30 }
  0xb3   : > { %194 = vst [vmem:[%s134_s17 + $0x28] sm:$0xff] %v186_v32 }
  0xb5   : > { %v173_v33 = vpop.permute.xlu1 %172  ;;  %v171_v35 = vpop.permute.xlu0 %170 }
  0xb6   : > { %v184_v34 = vsel %vm180_vm1, %v169_v30, %v173_v33  ;;  %v183_v36 = vsel %vm180_vm1, %v167_v27, %v171_v35 }
  0xb7   : > { %195 = vst [vmem:[%s134_s17 + $0x30] sm:$0xff] %v184_v34  ;;  %191 = vst [vmem:[%s134_s17 + $0x10] sm:$0xff] %v183_v36 }
  0xb9   : > { %v177_v37 = vpop.permute.xlu1 %176  ;;  %v175_v40 = vpop.permute.xlu0 %174 }
  0xba   : > { %v182_v38 = vsel %vm180_vm1, %v173_v33, %v177_v37  ;;  %v188_v39 = vsel %vm180_vm1, %v177_v37, %v165_v31  ;;  %v181_v41 = vsel %vm180_vm1, %v171_v35, %v175_v40  ;;  %v187_v42 = vsel %vm180_vm1, %v175_v40, %v163_v28 }
  0xbb   : > { %193 = vst [vmem:[%s134_s17 + $0x20] sm:$0xff] %v188_v39  ;;  %196 = vst [vmem:[%s134_s17 + $0x38] sm:$0xff] %v182_v38 }
  0xbc   : > { %189 = vst [vmem:[%s134_s17] sm:$0xff] %v187_v42  ;;  %192 = vst [vmem:[%s134_s17 + $0x18] sm:$0xff] %v181_v41 }
  0xbd   : > { %392 = shalt.err (!%p389_p10)
}
  0xbe   : > { %s393_s14 = scalar_lea.hbm %s589_s3, 1024  ;;  %s397_s21 = scalar_lea.hbm %s637_s1, 2048 }
  0xbf   : > { %p394_p0 = scmp.ne.s32.totalorder %s589_s3, %s393_s14  ;;  %p398_p1 = scmp.lt.s32.totalorder %s589_s3, %s637_s1 }
  0xc0   : > { %p399_p3 = scmp.lt.s32.totalorder %s397_s21, %s393_s14 }
  0xc1   : > { %p395_p2 = pnand %p394_p0, %p646_p12 }
  0xc2   : > { %p400_p6 = por %p399_p3, %p398_p1 }
  0xc3   : > { %p396_p9 = pneg %p395_p2 }
  0xc5   : > { %p401_p11 = pnand %p400_p6, %p396_p9 }
  0xc7   : > { %404 = shalt.err (!%p401_p11)
}
  0xc8   : > { %s450_s26 = smov 512   ;;  %s451_s30 = smov 32  }
  0xc9   : > { %302 = dma.vmem_to_hbm [thread:$0]  (%p646_p12), %s584_s27, 1024, %s589_s3, %s198_s10, %s450_s26, %s450_s26, %s451_s30  }
  0xca PF: > { %s226_s25 = sand.u32 1, %s431_s6   ;;  %p647_p13 = scmp.ne.s32.totalorder %s643_s19, 0 }
  0xcb   : > { %p648_p4 = scmp.ge.s32.totalorder %s443_s9, 2  ;;  %s227_s17 = scalar_lea.sflag [#allocation4], %s226_s25 }
  0xcd   : > { %p309_p5 = pnand %p648_p4, %p647_p13 }
  0xcf   : > { %p310_p7 = pneg %p309_p5 }
  0xd1   : > { %426 = dma.done.wait (%p310_p7), %s227_s17, 1024  }
  0xd2   : > { %428 = vsyncadd (%p310_p7), %s227_s17, 4294966272  ;;  %p14_p8 = scmp.ge.s32.totalorder %s487_s12, 4   ;;  %s649_s6 = smov %s435_s7 }
  0xd3   : > { %s650_s7 = smov %s439_s8  ;;  %s651_s8 = smov %s499_s15 }
  0xd4   : > { %s652_s9 = smov %s487_s12  ;;  %16 = sbr.rel (!%p14_p8) target bundleno = 5 (0x5), region = 69 }
  0xd9   :  { %232 = vsyncpa [#allocation3], 1 }
  0xda   :  { %234 = vsyncpa [#allocation3 + $0x1], 1 }
  0xdb   :  { %235 = vsyncpa [#allocation4], 1 }
  0xdc   :  { %237 = vsyncpa [#allocation4 + $0x1], 1 }

</bundles_post_ra>
